<compile_context>
chip_gen: v5e
topology: v5e:2x2
jax: 0.10.0
libtpu: 0.0.40
codegen_flags: <defaults>
</compile_context>

<pallas_src>
import functools

import jax
import jax.numpy as jnp
import numpy as np
from jax import lax
from jax.experimental import pallas as pl
from jax.experimental.pallas import tpu as pltpu


def _room_verts_kernel(corners_ref, verts_ref, *, n_corners, height):
    """corners_ref: (2, N) SoA (rows = x, y); verts_ref: (3, 2N) lane-dense.

    verts_ref columns 0..N-1 are the bottom ring (z = 0), columns N..2N-1 the
    top ring (z = height).  Single unsliced full-tile store.
    """
    N = n_corners
    c = corners_ref[...]                                     # (2, N)
    xy = jnp.tile(c, (1, 2))                                 # (2, 2N): bottom | top
    col = lax.broadcasted_iota(jnp.int32, (1, 2 * N), 1)
    z = jnp.where(col >= N, jnp.float32(height), jnp.float32(0.0))  # (1, 2N)
    verts_ref[...] = jnp.concatenate([xy, z], axis=0)        # one full-tile store


def _make_faces(n_corners: int) -> np.ndarray:
    """Static face connectivity: two triangles per wall segment (trace-time)."""
    i = np.arange(n_corners, dtype=np.int32)
    ni = (i + 1) % n_corners
    lower = np.stack([i, ni, n_corners + i], axis=1)                 # [i, i+1, N+i]
    upper = np.stack([n_corners + i, ni, n_corners + ni], axis=1)    # [N+i, i+1, N+i+1]
    faces = np.empty((2 * n_corners, 3), np.int32)
    faces[0::2] = lower
    faces[1::2] = upper
    return faces


def room_model_forward(corners, height):
    """corners: (N, 2) float32, height: python float -> (verts (2N,3), faces (2N,3))."""
    N = corners.shape[0]
    corners_t = jnp.transpose(corners.astype(jnp.float32))   # (2, N) SoA, N on lanes

    kernel = functools.partial(_room_verts_kernel, n_corners=N, height=float(height))
    verts_t = pl.pallas_call(
        kernel,
        out_shape=jax.ShapeDtypeStruct((3, 2 * N), jnp.float32),
        in_specs=[pl.BlockSpec(memory_space=pltpu.MemorySpace.VMEM)],
        out_specs=pl.BlockSpec(memory_space=pltpu.MemorySpace.VMEM),
        cost_estimate=pl.CostEstimate(
            flops=0,
            transcendentals=0,
            bytes_accessed=(2 * N) * 4 + (3 * 2 * N) * 4,
        ),
    )(corners_t)

    verts = jnp.transpose(verts_t)          # (2N, 3): PyTorch layout, wrapper-side
    faces = jnp.asarray(_make_faces(N))     # static constant, no kernel work
    return verts, faces


if __name__ == "__main__":
    key = jax.random.PRNGKey(0)
    N = 8               # number of 2D room corners ("init_params")
    HEIGHT = 2.5        # default wall height from __init__

    # deterministic synthetic init_params: perturbed regular octagon floor plan
    angles = jnp.linspace(0.0, 2.0 * jnp.pi, N, endpoint=False)
    radius = 3.0 + 0.2 * jax.random.uniform(key, (N,))
    corners = jnp.stack(
        [radius * jnp.cos(angles), radius * jnp.sin(angles)], axis=1
    ).astype(jnp.float32)

    verts, faces = room_model_forward(corners, HEIGHT)
    verts, faces = jax.block_until_ready((verts, faces))

    # reference check (mirrors the PyTorch forward exactly)
    cn = np.asarray(corners)
    bottom_ref = np.concatenate([cn, np.zeros((N, 1), np.float32)], axis=1)
    top_ref = np.concatenate([cn, np.full((N, 1), HEIGHT, np.float32)], axis=1)
    verts_expected = np.concatenate([bottom_ref, top_ref], axis=0)
    faces_expected = []
    for i in range(N):
        ni = (i + 1) % N
        faces_expected.append([i, ni, N + i])
        faces_expected.append([N + i, ni, N + ni])
    faces_expected = np.asarray(faces_expected, np.int32)

    np.testing.assert_allclose(np.asarray(verts), verts_expected, rtol=1e-6, atol=1e-6)
    np.testing.assert_array_equal(np.asarray(faces), faces_expected)
    print("KERNEL_OK")
</pallas_src>

<mosaic_0001>
module attributes {stable_mosaic.version = 11 : i64} {
  func.func @_room_verts_kernel(%arg0: memref<2x8xf32, #tpu.memory_space<vmem>>, %arg1: memref<3x16xf32, #tpu.memory_space<vmem>>) attributes {dimension_semantics = [], scalar_prefetch = 0 : i64, scratch_operands = 0 : i64, tpu.core_type = #tpu.core_type<tc>} {
    %c0 = arith.constant 0 : index
    %c0_0 = arith.constant 0 : index
    %0 = vector.load %arg0[%c0, %c0_0] : memref<2x8xf32, #tpu.memory_space<vmem>>, vector<2x8xf32>
    %1 = tpu.concatenate %0, %0 in 1 : vector<2x8xf32>, vector<2x8xf32> -> vector<2x16xf32>
    %2 = tpu.iota {dimensions = array<i32: 1>} : vector<1x16xi32>
    %c8_i32 = arith.constant 8 : i32
    %3 = vector.broadcast %c8_i32 : i32 to vector<1x16xi32>
    %4 = arith.cmpi sge, %2, %3 : vector<1x16xi32>
    %cst = arith.constant 2.500000e+00 : f32
    %cst_1 = arith.constant 0.000000e+00 : f32
    %5 = vector.broadcast %cst : f32 to vector<1x16xf32>
    %6 = vector.broadcast %cst_1 : f32 to vector<1x16xf32>
    %7 = arith.select %4, %5, %6 : vector<1x16xi1>, vector<1x16xf32>
    %8 = tpu.concatenate %1, %7 in 0 : vector<2x16xf32>, vector<1x16xf32> -> vector<3x16xf32>
    %c0_2 = arith.constant 0 : index
    %c0_3 = arith.constant 0 : index
    %9 = vector.load %arg1[%c0_2, %c0_3] : memref<3x16xf32, #tpu.memory_space<vmem>>, vector<3x16xf32>
    tpu.vector_store %arg1[%c0_2, %c0_3], %8 {strides = array<i32>} : memref<3x16xf32, #tpu.memory_space<vmem>>, vector<3x16xf32>,
    return
  }
}

</mosaic_0001>

<bundles_post_ra>
// kernel: tpu_custom_call.1
= control target key start
LH: loop header
LB: loop body
LE: loop exit
PB: predicated region body
PF: predicated region fallthrough
CT: control target
= control target key end

     0   :  { %6 = vsyncpa [#allocation3], 0  ;;  %s131_s0 = inlined_call_operand.hbm [shape: f32[2,8], index: 0, kind: input, shape index: {}]   ;;  %s132_s1 = inlined_call_operand.hbm [shape: f32[3,16], index: 1, kind: output, shape index: {}]  }
   0x1   :  { %7 = vsyncpa [#allocation4], 0  ;;  %s13_s8 = sshll.u32 %s131_s0, 4  ;;  %s111_s9 = smov [#allocation2]   ;;  %s14_s8 = int_to_ptr.hbm [resolvable:$true] %s13_s8 }
   0x2   :  { %s15_s10 = sshll.u32 %s111_s9, 4  ;;  %s16_s10 = int_to_ptr.vmem [resolvable:$true] %s15_s10 }
   0x3   :  { %18 = dma.hbm_to_vmem [thread:$0]  %s14_s8, 32, %s16_s10, [#allocation3]  }
   0x4   :  { %107 = dma.done.wait [#allocation3], 32  }
   0x5   :  { %108 = vsyncadd [#allocation3], 4294967264  ;;  %v23_v0 = vld [vmem:[#allocation2] sm:$0x3]  ;;  %s112_s11 = smov 8   ;;  %v30_v1 = vlaneseq  ;;  %vm28_vm1 = vcmask 64512  }
   0x6   :  { %25 = vrot.lane.b32.xlu0 %v23_v0, %s112_s11  ;;  %s113_s12 = smov [#allocation5]   ;;  %s45_s0 = sshll.u32 %s132_s1, 4  ;;  %v114_v3 = vmov 0.0   ;;  %vm34_vm2 = vcmask 1041408   ;;  %vm36_vm3 = vcmask 124928   ;;  %s46_s0 = int_to_ptr.hbm [resolvable:$true] %s45_s0 }
   0x7   :  { %v31_v2 = vand.u32 127, %v30_v1  ;;  %s43_s13 = sshll.u32 %s113_s12, 4  ;;  %s44_s13 = int_to_ptr.vmem [resolvable:$true] %s43_s13 }
   0x9   :  { %vm32_vm0 = vcmp.ge.s32.totalorder %v31_v2, 8 }
   0xa   :  { %v33_v4 = vsel %vm32_vm0, 2.5, %v114_v3 }
  0x78   :  { %v26_v5 = vpop.permute.xlu0 %25 }
  0x79   :  { %v29_v6 = vsel %vm28_vm1, %v23_v0, %v26_v5 }
  0x7a   :  { %v35_v7 = vsel %vm34_vm2, %v29_v6, %v33_v4 }
  0x7b   :  { %37 = vst.msk [vmem:[#allocation5] sm:$0x7] %vm36_vm3, %v35_v7 }
  0x7c   :  { %48 = dma.vmem_to_hbm [thread:$0]  %s44_s13, 64, %s46_s0, [#allocation4]  }
  0x7d   :  { %109 = dma.done.wait [#allocation4], 64  }
  0x7e   :  { %110 = vsyncadd [#allocation4], 4294967232 }
  0x7f   :  { %53 = vsyncpa [#allocation3], 1 }
  0x80   :  { %54 = vsyncpa [#allocation4], 1 }

</bundles_post_ra>
